<compile_context>
chip_gen: v5e
topology: v5e:2x2
jax: 0.10.0
libtpu: 0.0.40
codegen_flags: <defaults>
</compile_context>

<pallas_src>
import functools

import jax
import jax.numpy as jnp
import numpy as np
from jax.experimental import pallas as pl
from jax.experimental.pallas import tpu as pltpu

# -------------------------- synthetic configuration --------------------------
BATCH = 2
B_PAD = 16          # pad batch to a fully packed bf16 vreg (16 sublanes)
NUM_NODES = 128
NUM_SYNAPSES = 512
NUM_PASSES = 3
NUM_CLASSES = 8
PAD_CLASSES = 128   # lane-dense readout width (zero-padded columns)
DTYPE = jnp.float32
WDTYPE = jnp.bfloat16


# ------------------------------- Pallas kernel -------------------------------
def _fused_forward_kernel(x_ref, at_ref, thr_ref, w_ref, b_ref, o_ref, *, num_passes):
    """Whole FullGraphModel.forward in one VMEM-resident kernel.

    x_ref:   (B_PAD, N)        node activations (f32, batch padded to 16 rows)
    at_ref:  (N, N)            A^T in bf16, A[dst, src] = edge_weight * sigmoid(mult)
    thr_ref: (1, N)            |neuron_activation_threshold| (f32)
    w_ref:   (N, PAD_CLASSES)  zero-padded final_fc weight (bf16): rows at decision
                               neurons hold fc_w.T, all other rows/columns are zero
    b_ref:   (1, PAD_CLASSES)  final_fc bias, zero-padded to 128 lanes (f32)
    o_ref:   (B_PAD, PAD_CLASSES)  logits (lane-dense; real classes in [:, :8])
    """
    x = x_ref[...]                                   # f32 activations
    a_t = at_ref[...]                                # bf16 weights
    # Hoist the (1,N)->(B,N) broadcast out of the pass loop (no CSE of broadcasts).
    thr_b = jnp.broadcast_to(thr_ref[...], x.shape)  # f32

    # Statically unrolled connectome passes (num_passes is a compile-time constant).
    for _ in range(num_passes):
        # message(): x_j * edge_weight * sigmoid(multiplier); aggr='add'  -> x @ A^T
        agg = jnp.dot(x.astype(WDTYPE), a_t, preferred_element_type=jnp.float32)
        # update() with train_neurons: sigmoid(temp - |threshold|)   (f32 epilogue)
        x = jax.nn.sigmoid(agg - thr_b)

    # decision_making_mask + final_fc fused: zero rows of w_ref kill masked neurons;
    # zero-padded columns give a lane-dense (·,128) MXU operand and unmasked stores.
    logits = jnp.dot(x.astype(WDTYPE), w_ref[...],
                     preferred_element_type=jnp.float32) + b_ref[...]
    o_ref[...] = logits.astype(o_ref.dtype)


# --------------------------------- wrapper ------------------------------------
def full_graph_model_forward(x, params):
    """Mirrors FullGraphModel.forward in eval mode.

    x: (BATCH * NUM_NODES, 1)  == data.x for a batched disjoint connectome graph.
    """
    x_bn = x.reshape(BATCH, NUM_NODES)
    # Pad batch 2 -> 16 (full bf16 vreg height); padded rows become sigmoid(-thr)
    # garbage but every op is row-independent and they are sliced off below.
    x_pad = jnp.zeros((B_PAD, NUM_NODES), DTYPE).at[:BATCH].set(x_bn)

    kern = functools.partial(_fused_forward_kernel, num_passes=NUM_PASSES)
    vmem_spec = pl.BlockSpec(memory_space=pltpu.MemorySpace.VMEM)
    logits_pad = pl.pallas_call(
        kern,
        out_shape=jax.ShapeDtypeStruct((B_PAD, PAD_CLASSES), DTYPE),
        in_specs=[vmem_spec] * 5,
        out_specs=vmem_spec,
    )(x_pad, params["a_t"], params["abs_thr"], params["fc_w_pad"], params["fc_b_row"])

    # TODO(synk): eval-mode `intermediate_output` buffer (masked activations) is not
    # materialized; only the returned logits path is implemented.
    # final_layer == 'nn' -> no mean; train_neurons=True -> no x/x.norm();
    # eval mode -> dropouts are identity.
    return jnp.squeeze(logits_pad[:BATCH, :NUM_CLASSES])  # matches .squeeze()


def reference_forward(x, params):
    """Pure-jnp reference implementing the same (bf16-weight) numerics."""
    x_bn = x.reshape(BATCH, NUM_NODES)
    a_t = params["a_t"]
    thr = params["abs_thr"]
    for _ in range(NUM_PASSES):
        agg = jnp.dot(x_bn.astype(WDTYPE), a_t, preferred_element_type=jnp.float32)
        x_bn = jax.nn.sigmoid(agg - thr)
    logits = jnp.dot(x_bn.astype(WDTYPE), params["fc_w_pad"],
                     preferred_element_type=jnp.float32) + params["fc_b_row"]
    return jnp.squeeze(logits[:, :NUM_CLASSES])


# ------------------------------- param building --------------------------------
def build_params(key):
    keys = jax.random.split(key, 8)

    # graph_builder.synaptic_matrix (COO): deterministic random edges + weights.
    src = jax.random.randint(keys[0], (NUM_SYNAPSES,), 0, NUM_NODES)
    dst = jax.random.randint(keys[1], (NUM_SYNAPSES,), 0, NUM_NODES)
    edge_weight = jax.random.normal(keys[2], (NUM_SYNAPSES,), DTYPE) * 0.5

    # train_edges=True: edge_weight_multiplier ~ U(-1, 1); activation = sigmoid.
    edge_mult = jax.random.uniform(keys[3], (NUM_SYNAPSES,), DTYPE, -1.0, 1.0)
    eff_w = edge_weight * jax.nn.sigmoid(edge_mult)

    # Densify synaptic matrix: A[dst, src] += eff_w  (matches scatter-add aggr),
    # precompute the transpose once, store bf16 for the MXU.
    a_dense = jnp.zeros((NUM_NODES, NUM_NODES), DTYPE).at[dst, src].add(eff_w)
    a_t = a_dense.T.astype(WDTYPE)

    # train_neurons=True: neuron_activation_threshold ~ U(0, 0.1).
    thr = jax.random.uniform(keys[4], (NUM_NODES,), DTYPE, 0.0, 0.1)
    abs_thr = jnp.abs(thr).reshape(1, NUM_NODES)

    # decision_making_vector: every other neuron is a decision neuron (deterministic).
    dm_vec = (np.arange(NUM_NODES) % 2 == 0).astype(np.int32)
    dm_indices = np.nonzero(dm_vec == 1)[0]          # static indices
    # Folding the mask into fc_w_pad assumes PyTorch boolean-mask order == ascending
    # indices; assert so a non-sorted index set can never silently permute the readout.
    assert np.all(np.diff(dm_indices) > 0), "decision indices must be ascending"
    n_dm = int(dm_indices.shape[0])                  # final_layer_input_size ('nn')

    # final_fc = nn.Linear(n_dm, NUM_CLASSES); fold the decision mask into a
    # zero-padded, lane-dense (NUM_NODES, PAD_CLASSES) weight so the readout is a
    # plain full-lane matmul (columns >= NUM_CLASSES are zero and sliced off later).
    bound = 1.0 / np.sqrt(n_dm)
    fc_w = jax.random.uniform(keys[5], (NUM_CLASSES, n_dm), DTYPE, -bound, bound)
    fc_b = jax.random.uniform(keys[6], (NUM_CLASSES,), DTYPE, -bound, bound)
    fc_w_pad = (jnp.zeros((NUM_NODES, PAD_CLASSES), DTYPE)
                .at[dm_indices, :NUM_CLASSES].set(fc_w.T)).astype(WDTYPE)
    fc_b_row = jnp.zeros((1, PAD_CLASSES), DTYPE).at[0, :NUM_CLASSES].set(fc_b)

    params = dict(a_t=a_t, abs_thr=abs_thr, fc_w_pad=fc_w_pad, fc_b_row=fc_b_row)
    return params, keys[7]


# ----------------------------------- main --------------------------------------
if __name__ == "__main__":
    params, key_x = build_params(jax.random.PRNGKey(0))

    # data.x: (batch * num_nodes, 1) node features, num_features = 1.
    x = jax.random.uniform(key_x, (BATCH * NUM_NODES, 1), DTYPE)

    out = full_graph_model_forward(x, params)
    out = jax.block_until_ready(out)

    ref = reference_forward(x, params)
    np.testing.assert_allclose(np.asarray(out), np.asarray(ref), rtol=2e-3, atol=2e-3)
    assert out.shape == (BATCH, NUM_CLASSES)

    print("KERNEL_OK")
</pallas_src>

<mosaic_0001>
module attributes {stable_mosaic.version = 11 : i64} {
  func.func @_fused_forward_kernel(%arg0: memref<16x128xf32, #tpu.memory_space<vmem>>, %arg1: memref<128x128xbf16, #tpu.memory_space<vmem>>, %arg2: memref<1x128xf32, #tpu.memory_space<vmem>>, %arg3: memref<128x128xbf16, #tpu.memory_space<vmem>>, %arg4: memref<1x128xf32, #tpu.memory_space<vmem>>, %arg5: memref<16x128xf32, #tpu.memory_space<vmem>>) attributes {dimension_semantics = [], scalar_prefetch = 0 : i64, scratch_operands = 0 : i64, tpu.core_type = #tpu.core_type<tc>} {
    %c0 = arith.constant 0 : index
    %c0_0 = arith.constant 0 : index
    %0 = vector.load %arg0[%c0, %c0_0] : memref<16x128xf32, #tpu.memory_space<vmem>>, vector<16x128xf32>
    %c0_1 = arith.constant 0 : index
    %c0_2 = arith.constant 0 : index
    %1 = vector.load %arg1[%c0_1, %c0_2] : memref<128x128xbf16, #tpu.memory_space<vmem>>, vector<128x128xbf16>
    %c0_3 = arith.constant 0 : index
    %c0_4 = arith.constant 0 : index
    %2 = vector.load %arg2[%c0_3, %c0_4] : memref<1x128xf32, #tpu.memory_space<vmem>>, vector<1x128xf32>
    %3 = vector.shape_cast %2 : vector<1x128xf32> to vector<1x128xf32>
    %4 = vector.broadcast %3 : vector<1x128xf32> to vector<16x128xf32>
    %5 = arith.truncf %0 : vector<16x128xf32> to vector<16x128xbf16>
    %cst = arith.constant dense<0.000000e+00> : vector<16x128xf32>
    %6 = tpu.matmul %5, %1, %cst {dimension_numbers = #tpu.dot_dimension_numbers<[1], [0], [0], [1], [0, 0, 1, 1], [], []>} : vector<16x128xbf16>, vector<128x128xbf16>, vector<16x128xf32> -> vector<16x128xf32>
    %7 = arith.subf %6, %4 : vector<16x128xf32>
    %8 = arith.negf %7 : vector<16x128xf32>
    %9 = math.exp %8 : vector<16x128xf32>
    %cst_5 = arith.constant 1.000000e+00 : f32
    %10 = vector.broadcast %cst_5 : f32 to vector<16x128xf32>
    %11 = arith.addf %10, %9 : vector<16x128xf32>
    %12 = arith.divf %10, %11 : vector<16x128xf32>
    %13 = arith.truncf %12 : vector<16x128xf32> to vector<16x128xbf16>
    %cst_6 = arith.constant dense<0.000000e+00> : vector<16x128xf32>
    %14 = tpu.matmul %13, %1, %cst_6 {dimension_numbers = #tpu.dot_dimension_numbers<[1], [0], [0], [1], [0, 0, 1, 1], [], []>} : vector<16x128xbf16>, vector<128x128xbf16>, vector<16x128xf32> -> vector<16x128xf32>
    %15 = arith.subf %14, %4 : vector<16x128xf32>
    %16 = arith.negf %15 : vector<16x128xf32>
    %17 = math.exp %16 : vector<16x128xf32>
    %cst_7 = arith.constant 1.000000e+00 : f32
    %18 = vector.broadcast %cst_7 : f32 to vector<16x128xf32>
    %19 = arith.addf %18, %17 : vector<16x128xf32>
    %20 = arith.divf %18, %19 : vector<16x128xf32>
    %21 = arith.truncf %20 : vector<16x128xf32> to vector<16x128xbf16>
    %cst_8 = arith.constant dense<0.000000e+00> : vector<16x128xf32>
    %22 = tpu.matmul %21, %1, %cst_8 {dimension_numbers = #tpu.dot_dimension_numbers<[1], [0], [0], [1], [0, 0, 1, 1], [], []>} : vector<16x128xbf16>, vector<128x128xbf16>, vector<16x128xf32> -> vector<16x128xf32>
    %23 = arith.subf %22, %4 : vector<16x128xf32>
    %24 = arith.negf %23 : vector<16x128xf32>
    %25 = math.exp %24 : vector<16x128xf32>
    %cst_9 = arith.constant 1.000000e+00 : f32
    %26 = vector.broadcast %cst_9 : f32 to vector<16x128xf32>
    %27 = arith.addf %26, %25 : vector<16x128xf32>
    %28 = arith.divf %26, %27 : vector<16x128xf32>
    %29 = arith.truncf %28 : vector<16x128xf32> to vector<16x128xbf16>
    %c0_10 = arith.constant 0 : index
    %c0_11 = arith.constant 0 : index
    %30 = vector.load %arg3[%c0_10, %c0_11] : memref<128x128xbf16, #tpu.memory_space<vmem>>, vector<128x128xbf16>
    %cst_12 = arith.constant dense<0.000000e+00> : vector<16x128xf32>
    %31 = tpu.matmul %29, %30, %cst_12 {dimension_numbers = #tpu.dot_dimension_numbers<[1], [0], [0], [1], [0, 0, 1, 1], [], []>} : vector<16x128xbf16>, vector<128x128xbf16>, vector<16x128xf32> -> vector<16x128xf32>
    %c0_13 = arith.constant 0 : index
    %c0_14 = arith.constant 0 : index
    %32 = vector.load %arg4[%c0_13, %c0_14] : memref<1x128xf32, #tpu.memory_space<vmem>>, vector<1x128xf32>
    %33 = vector.broadcast %32 : vector<1x128xf32> to vector<16x128xf32>
    %34 = arith.addf %31, %33 : vector<16x128xf32>
    %c0_15 = arith.constant 0 : index
    %c0_16 = arith.constant 0 : index
    %35 = vector.load %arg5[%c0_15, %c0_16] : memref<16x128xf32, #tpu.memory_space<vmem>>, vector<16x128xf32>
    tpu.vector_store %arg5[%c0_15, %c0_16], %34 {strides = array<i32>} : memref<16x128xf32, #tpu.memory_space<vmem>>, vector<16x128xf32>,
    return
  }
}

</mosaic_0001>

<bundles_post_ra>
// kernel: tpu_custom_call.1
= control target key start
LH: loop header
LB: loop body
LE: loop exit
PB: predicated region body
PF: predicated region fallthrough
CT: control target
= control target key end

     0   :  { %10 = vsyncpa [#allocation3], 0  ;;  %s700_s0 = inlined_call_operand.hbm [shape: f32[16,128], index: 0, kind: input, shape index: {}]   ;;  %s701_s1 = inlined_call_operand.hbm [shape: bf16[128,128], index: 1, kind: input, shape index: {}]   ;;  %s702_s2 = inlined_call_operand.vmem [shape: f32[1,128], index: 2, kind: input, shape index: {}]   ;;  %s703_s3 = inlined_call_operand.hbm [shape: bf16[128,128], index: 3, kind: input, shape index: {}]   ;;  %s704_s4 = inlined_call_operand.vmem [shape: f32[1,128], index: 4, kind: input, shape index: {}]   ;;  %s705_s5 = inlined_call_operand.hbm [shape: f32[16,128], index: 5, kind: output, shape index: {}]  }
   0x1   :  { %11 = vsyncpa [#allocation6], 0  ;;  %s30_s20 = sshll.u32 %s701_s1, 4  ;;  %s31_s20 = int_to_ptr.hbm [resolvable:$true] %s30_s20 }
   0x2   :  { %12 = vsyncpa [#allocation4], 0  ;;  %s630_s21 = smov [#allocation5]   ;;  %s17_s25 = sshll.u32 %s700_s0, 4  ;;  %s18_s25 = int_to_ptr.hbm [resolvable:$true] %s17_s25 }
   0x3   :  { %s32_s22 = sshll.u32 %s630_s21, 4  ;;  %s631_s26 = smov 64   ;;  %s33_s22 = int_to_ptr.vmem [resolvable:$true] %s32_s22 }
   0x4   :  { %s632_s27 = smov 4   ;;  %s633_s28 = smov [#allocation2]  }
   0x5   :  { %38 = dma.hbm_to_vmem [thread:$0]  %s31_s20, 1024, %s33_s22, [#allocation6], %s631_s26, %s631_s26, %s632_s27  }
   0x6   :  { %s19_s29 = sshll.u32 %s633_s28, 4  ;;  %s634_s30 = smov 128   ;;  %s20_s29 = int_to_ptr.vmem [resolvable:$true] %s19_s29 }
   0x7   :  { %s635_s6 = smov 8   ;;  %s45_s8 = sshll.u32 %s703_s3, 4  ;;  %s46_s8 = int_to_ptr.hbm [resolvable:$true] %s45_s8 }
   0x8   :  { %25 = dma.hbm_to_vmem [thread:$0]  %s18_s25, 256, %s20_s29, [#allocation3], %s634_s30, %s634_s30, %s635_s6  }
   0x9   :  { %s636_s9 = smov [#allocation7]  }
   0xa   :  { %s47_s0 = sshll.u32 %s636_s9, 4  ;;  %s48_s0 = int_to_ptr.vmem [resolvable:$true] %s47_s0 }
   0xb   :  { %53 = dma.hbm_to_vmem [thread:$0]  %s46_s8, 1024, %s48_s0, [#allocation6], %s631_s26, %s631_s26, %s632_s27  }
   0xc   :  { %624 = dma.done.wait [#allocation3], 256  }
   0xd   :  { %625 = vsyncadd [#allocation3], 4294967040 }
   0xe   :  { %626 = dma.done.wait [#allocation6], 2048  }
   0xf   :  { %627 = vsyncadd [#allocation6], 4294965248  ;;  %v485_v0 = vld [vmem:[#allocation5 + $0x38] sm:$0xff]  ;;  %v484_v1 = vld [vmem:[#allocation5 + $0x30] sm:$0xff]  ;;  %s637_s12 = smov [#allocation8]   ;;  %s394_s16 = sshll.u32 %s705_s5, 4  ;;  %s395_s16 = int_to_ptr.hbm [resolvable:$true] %s394_s16 }
  0x10   :  { %139 = vmatpush.bf16.msra.mxu0 %v485_v0  ;;  %194 = vmatpush.bf16.msra.mxu1 %v485_v0  ;;  %v483_v2 = vld [vmem:[#allocation5 + $0x28] sm:$0xff]  ;;  %v482_v3 = vld [vmem:[#allocation5 + $0x20] sm:$0xff]  ;;  %v481_v4 = vld [vmem:[#allocation5 + $0x18] sm:$0xff]  ;;  %s392_s13 = sshll.u32 %s637_s12, 4  ;;  %s393_s13 = int_to_ptr.vmem [resolvable:$true] %s392_s13 }
  0x11   :  { %249 = vmatpush.bf16.msra.mxu2 %v485_v0  ;;  %v480_v5 = vld [vmem:[#allocation5 + $0x10] sm:$0xff]  ;;  %v479_v6 = vld [vmem:[#allocation5 + $0x8] sm:$0xff]  ;;  %v478_v7 = vld [vmem:[#allocation5] sm:$0xff] }
  0x12   :  { %v68_v8 = vld [vmem:[#allocation2] sm:$0xff]  ;;  %v69_v9 = vld [vmem:[#allocation2 + $0x8] sm:$0xff] }
  0x13   :  { %v90_v10 = vpack.c.bf16 %v69_v9, %v68_v8  ;;  %v683_v11 = vld [vmem:[%s702_s2] ss:$0 sm:$0xff] }
  0x14   :  { %140 = vmatpush.bf16.msra.mxu0 %v484_v1  ;;  %195 = vmatpush.bf16.msra.mxu1 %v484_v1 }
  0x15   :  { %250 = vmatpush.bf16.msra.mxu2 %v484_v1 }
  0x18   :  { %141 = vmatpush.bf16.msra.mxu0 %v483_v2  ;;  %196 = vmatpush.bf16.msra.mxu1 %v483_v2 }
  0x19   :  { %251 = vmatpush.bf16.msra.mxu2 %v483_v2 }
  0x1c   :  { %142 = vmatpush.bf16.msra.mxu0 %v482_v3  ;;  %197 = vmatpush.bf16.msra.mxu1 %v482_v3 }
  0x1d   :  { %252 = vmatpush.bf16.msra.mxu2 %v482_v3 }
  0x20   :  { %143 = vmatpush.bf16.msra.mxu0 %v481_v4  ;;  %198 = vmatpush.bf16.msra.mxu1 %v481_v4 }
  0x21   :  { %253 = vmatpush.bf16.msra.mxu2 %v481_v4 }
  0x24   :  { %144 = vmatpush.bf16.msra.mxu0 %v480_v5  ;;  %199 = vmatpush.bf16.msra.mxu1 %v480_v5 }
  0x25   :  { %254 = vmatpush.bf16.msra.mxu2 %v480_v5 }
  0x28   :  { %145 = vmatpush.bf16.msra.mxu0 %v479_v6  ;;  %200 = vmatpush.bf16.msra.mxu1 %v479_v6 }
  0x29   :  { %255 = vmatpush.bf16.msra.mxu2 %v479_v6 }
  0x2c   :  { %146 = vmatpush.bf16.msra.mxu0 %v478_v7  ;;  %201 = vmatpush.bf16.msra.mxu1 %v478_v7 }
  0x2d   :  { %256 = vmatpush.bf16.msra.mxu2 %v478_v7 }
  0x2f   :  { %147 = vmatmul.bf16.vlgmr.msra.gmra.mxu0 %v90_v10  ;;  %v493_v10 = vld [vmem:[#allocation7 + $0x38] sm:$0xff] }
  0x30   :  { %372 = vmatpush.bf16.msra.mxu3 %v493_v10 }
  0xac   :  { %v148_v12 = vpop.f32.mrf.mxu0 }
  0xad   :  { %v153_v13 = vsub.f32 %v148_v12, %v683_v11  ;;  %v492_v12 = vld [vmem:[#allocation7 + $0x30] sm:$0xff] }
  0xae   :  { %373 = vmatpush.bf16.msra.mxu3 %v492_v12 }
  0xaf   :  { %v440_v14 = vmul.f32 -1.442695, %v153_v13  ;;  %v491_v13 = vld [vmem:[#allocation7 + $0x28] sm:$0xff] }
  0xb1   :  { %504 = vpow2.f32 %v440_v14  ;;  %v490_v14 = vld [vmem:[#allocation7 + $0x20] sm:$0xff] }
  0xb2   :  { %374 = vmatpush.bf16.msra.mxu3 %v491_v13 }
  0xb4   :  { %v150_v15 = vpop.f32.mrf.mxu0 }
  0xb5   :  { %v154_v16 = vsub.f32 %v150_v15, %v683_v11  ;;  %v489_v15 = vld [vmem:[#allocation7 + $0x18] sm:$0xff] }
  0xb6   :  { %375 = vmatpush.bf16.msra.mxu3 %v490_v14 }
  0xb7   :  { %v505_v17 = vpop.eup %504  ;;  %v441_v18 = vmul.f32 -1.442695, %v154_v16  ;;  %v488_v16 = vld [vmem:[#allocation7 + $0x10] sm:$0xff] }
  0xb8   :  { %v161_v19 = vadd.f32 1.0, %v505_v17  ;;  %v487_v17 = vld [vmem:[#allocation7 + $0x8] sm:$0xff] }
  0xb9   :  { %506 = vpow2.f32 %v441_v18 }
  0xba   :  { %508 = vrcp.f32 %v161_v19  ;;  %vm168_vm1 = vweird.f32 %v161_v19  ;;  %v174_v30 = vand.u32 2147483648, %v161_v19  ;;  %v172_v32 = vand.u32 2147483647, %v161_v19  ;;  %376 = vmatpush.bf16.msra.mxu3 %v489_v15 }
  0xbc   :  { %v175_v37 = vor.u32 1.1754944e-38, %v174_v30  ;;  %vm173_vm6 = vcmp.eq.f32.partialorder %v172_v32, 8.507059e+37 }
  0xbe   :  { %377 = vmatpush.bf16.msra.mxu3 %v488_v16 }
  0xbf   :  { %v507_v20 = vpop.eup %506 }
  0xc0   :  { %v509_v21 = vpop.eup %508  ;;  %v162_v22 = vadd.f32 1.0, %v507_v20  ;;  %v486_v20 = vld [vmem:[#allocation7] sm:$0xff] }
  0xc1   :  { %v164_v23 = vmul.f32 %v509_v21, %v161_v19  ;;  %vm169_vm0 = vweird.f32 %v509_v21 }
  0xc2   :  { %510 = vrcp.f32 %v162_v22  ;;  %v189_v31 = vand.u32 2147483648, %v162_v22  ;;  %v187_v34 = vand.u32 2147483647, %v162_v22  ;;  %vm170_vm3 = vmor %vm168_vm1, %vm169_vm0  ;;  %vm183_vm4 = vweird.f32 %v162_v22  ;;  %378 = vmatpush.bf16.msra.mxu3 %v487_v17 }
  0xc3   :  { %v165_v24 = vsub.f32 1.0, %v164_v23 }
  0xc4   :  { %v190_v38 = vor.u32 1.1754944e-38, %v189_v31  ;;  %vm188_vm7 = vcmp.eq.f32.partialorder %v187_v34, 8.507059e+37 }
  0xc5   :  { %v166_v25 = vmul.f32 %v509_v21, %v165_v24 }
  0xc6   :  { %379 = vmatpush.bf16.msra.mxu3 %v486_v20 }
  0xc7   :  { %v167_v28 = vadd.f32 %v509_v21, %v166_v25 }
  0xc8   :  { %v511_v26 = vpop.eup %510 }
  0xc9   :  { %v179_v27 = vmul.f32 %v511_v26, %v162_v22  ;;  %vm184_vm2 = vweird.f32 %v511_v26  ;;  %v171_v35 = vsel %vm170_vm3, %v509_v21, %v167_v28 }
  0xca   :  { %vm185_vm5 = vmor %vm183_vm4, %vm184_vm2  ;;  %v176_v40 = vsel %vm173_vm6, %v175_v37, %v171_v35 }
  0xcb   :  { %v180_v29 = vsub.f32 1.0, %v179_v27 }
  0xcd   :  { %v181_v33 = vmul.f32 %v511_v26, %v180_v29 }
  0xcf   :  { %v182_v36 = vadd.f32 %v511_v26, %v181_v33 }
  0xd1   :  { %v186_v39 = vsel %vm185_vm5, %v511_v26, %v182_v36 }
  0xd2   :  { %v191_v41 = vsel %vm188_vm7, %v190_v38, %v186_v39 }
  0xd3   :  { %v193_v42 = vpack.c.bf16 %v191_v41, %v176_v40 }
  0xd5   :  { %202 = vmatmul.bf16.vlgmr.msra.gmra.mxu1 %v193_v42 }
 0x152   :  { %v203_v43 = vpop.f32.mrf.mxu1 }
 0x153   :  { %v208_v44 = vsub.f32 %v203_v43, %v683_v11 }
 0x155   :  { %v442_v45 = vmul.f32 -1.442695, %v208_v44 }
 0x157   :  { %512 = vpow2.f32 %v442_v45 }
 0x15a   :  { %v205_v46 = vpop.f32.mrf.mxu1 }
 0x15b   :  { %v209_v47 = vsub.f32 %v205_v46, %v683_v11 }
 0x15d   :  { %v513_v48 = vpop.eup %512  ;;  %v443_v49 = vmul.f32 -1.442695, %v209_v47 }
 0x15e   :  { %v216_v50 = vadd.f32 1.0, %v513_v48 }
 0x15f   :  { %514 = vpow2.f32 %v443_v49  ;;  %v503_v49 = vld [vmem:[%s704_s4] ss:$0 sm:$0xff] }
 0x160   :  { %516 = vrcp.f32 %v216_v50  ;;  %vm223_vm9 = vweird.f32 %v216_v50  ;;  %v229_v61 = vand.u32 2147483648, %v216_v50  ;;  %v227_v63 = vand.u32 2147483647, %v216_v50 }
 0x162   :  { %v230_v4 = vor.u32 1.1754944e-38, %v229_v61  ;;  %vm228_vm14 = vcmp.eq.f32.partialorder %v227_v63, 8.507059e+37 }
 0x165   :  { %v515_v51 = vpop.eup %514 }
 0x166   :  { %v517_v52 = vpop.eup %516  ;;  %v217_v53 = vadd.f32 1.0, %v515_v51 }
 0x167   :  { %v219_v54 = vmul.f32 %v517_v52, %v216_v50  ;;  %vm224_vm8 = vweird.f32 %v517_v52 }
 0x168   :  { %518 = vrcp.f32 %v217_v53  ;;  %v244_v62 = vand.u32 2147483648, %v217_v53  ;;  %v242_v1 = vand.u32 2147483647, %v217_v53  ;;  %vm225_vm11 = vmor %vm223_vm9, %vm224_vm8  ;;  %vm238_vm12 = vweird.f32 %v217_v53 }
 0x169   :  { %v220_v55 = vsub.f32 1.0, %v219_v54 }
 0x16a   :  { %v245_v5 = vor.u32 1.1754944e-38, %v244_v62  ;;  %vm243_vm15 = vcmp.eq.f32.partialorder %v242_v1, 8.507059e+37 }
 0x16b   :  { %v221_v56 = vmul.f32 %v517_v52, %v220_v55 }
 0x16d   :  { %v222_v59 = vadd.f32 %v517_v52, %v221_v56 }
 0x16e   :  { %v519_v57 = vpop.eup %518 }
 0x16f   :  { %v234_v58 = vmul.f32 %v519_v57, %v217_v53  ;;  %vm239_vm10 = vweird.f32 %v519_v57  ;;  %v226_v2 = vsel %vm225_vm11, %v517_v52, %v222_v59 }
 0x170   :  { %vm240_vm13 = vmor %vm238_vm12, %vm239_vm10  ;;  %v231_v7 = vsel %vm228_vm14, %v230_v4, %v226_v2 }
 0x171   :  { %v235_v60 = vsub.f32 1.0, %v234_v58 }
 0x173   :  { %v236_v0 = vmul.f32 %v519_v57, %v235_v60 }
 0x175   :  { %v237_v3 = vadd.f32 %v519_v57, %v236_v0 }
 0x177   :  { %v241_v6 = vsel %vm240_vm13, %v519_v57, %v237_v3 }
 0x178   :  { %v246_v8 = vsel %vm243_vm15, %v245_v5, %v241_v6 }
 0x179   :  { %v248_v9 = vpack.c.bf16 %v246_v8, %v231_v7 }
 0x17b   :  { %257 = vmatmul.bf16.vlgmr.msra.gmra.mxu2 %v248_v9 }
 0x1fe   :  { %v258_v18 = vpop.f32.mrf.mxu2 }
 0x1ff   :  { %v263_v19 = vsub.f32 %v258_v18, %v683_v11 }
 0x201   :  { %v444_v21 = vmul.f32 -1.442695, %v263_v19 }
 0x203   :  { %520 = vpow2.f32 %v444_v21 }
 0x206   :  { %v260_v22 = vpop.f32.mrf.mxu2 }
 0x207   :  { %v264_v23 = vsub.f32 %v260_v22, %v683_v11 }
 0x209   :  { %v521_v24 = vpop.eup %520  ;;  %v445_v25 = vmul.f32 -1.442695, %v264_v23 }
 0x20a   :  { %v271_v26 = vadd.f32 1.0, %v521_v24 }
 0x20b   :  { %522 = vpow2.f32 %v445_v25 }
 0x20c   :  { %524 = vrcp.f32 %v271_v26  ;;  %vm278_vm1 = vweird.f32 %v271_v26  ;;  %v284_v37 = vand.u32 2147483648, %v271_v26  ;;  %v282_v38 = vand.u32 2147483647, %v271_v26 }
 0x20e   :  { %v285_v43 = vor.u32 1.1754944e-38, %v284_v37  ;;  %vm283_vm6 = vcmp.eq.f32.partialorder %v282_v38, 8.507059e+37 }
 0x211   :  { %v523_v27 = vpop.eup %522 }
 0x212   :  { %v525_v28 = vpop.eup %524  ;;  %v272_v29 = vadd.f32 1.0, %v523_v27 }
 0x213   :  { %v274_v30 = vmul.f32 %v525_v28, %v271_v26  ;;  %vm279_vm0 = vweird.f32 %v525_v28 }
 0x214   :  { %526 = vrcp.f32 %v272_v29  ;;  %v299_v11 = vand.u32 2147483648, %v272_v29  ;;  %v297_v40 = vand.u32 2147483647, %v272_v29  ;;  %vm280_vm3 = vmor %vm278_vm1, %vm279_vm0  ;;  %vm293_vm4 = vweird.f32 %v272_v29 }
 0x215   :  { %v275_v31 = vsub.f32 1.0, %v274_v30 }
 0x216   :  { %v300_v44 = vor.u32 1.1754944e-38, %v299_v11  ;;  %vm298_vm7 = vcmp.eq.f32.partialorder %v297_v40, 8.507059e+37 }
 0x217   :  { %v276_v32 = vmul.f32 %v525_v28, %v275_v31 }
 0x219   :  { %v277_v35 = vadd.f32 %v525_v28, %v276_v32 }
 0x21a   :  { %v527_v33 = vpop.eup %526 }
 0x21b   :  { %v289_v34 = vmul.f32 %v527_v33, %v272_v29  ;;  %vm294_vm2 = vweird.f32 %v527_v33  ;;  %v281_v41 = vsel %vm280_vm3, %v525_v28, %v277_v35 }
 0x21c   :  { %vm295_vm5 = vmor %vm293_vm4, %vm294_vm2  ;;  %v286_v46 = vsel %vm283_vm6, %v285_v43, %v281_v41 }
 0x21d   :  { %v290_v36 = vsub.f32 1.0, %v289_v34 }
 0x21f   :  { %v291_v39 = vmul.f32 %v527_v33, %v290_v36 }
 0x221   :  { %v292_v42 = vadd.f32 %v527_v33, %v291_v39 }
 0x223   :  { %v296_v45 = vsel %vm295_vm5, %v527_v33, %v292_v42 }
 0x224   :  { %v301_v47 = vsel %vm298_vm7, %v300_v44, %v296_v45 }
 0x225   :  { %v303_v48 = vpack.c.bf16 %v301_v47, %v286_v46 }
 0x227   :  { %380 = vmatmul.bf16.vlgmr.msra.gmra.mxu3 %v303_v48 }
 0x2aa   :  { %v381_v50 = vpop.f32.mrf.mxu3 }
 0x2ab   :  { %v382_v51 = vadd.f32 %v503_v49, %v381_v50 }
 0x2ad   :  { %386 = vst [vmem:[#allocation8] sm:$0xff] %v382_v51 }
 0x2b2   :  { %v383_v52 = vpop.f32.mrf.mxu3 }
 0x2b3   :  { %v384_v53 = vadd.f32 %v503_v49, %v383_v52 }
 0x2b5   :  { %387 = vst [vmem:[#allocation8 + $0x8] sm:$0xff] %v384_v53 }
 0x2b6   :  { %400 = dma.vmem_to_hbm [thread:$0]  %s393_s13, 256, %s395_s16, [#allocation4], %s634_s30, %s634_s30, %s635_s6  }
 0x2b7   :  { %628 = dma.done.wait [#allocation4], 256  }
 0x2b8   :  { %629 = vsyncadd [#allocation4], 4294967040 }
 0x2b9   :  { %405 = vsyncpa [#allocation3], 1 }
 0x2ba   :  { %406 = vsyncpa [#allocation6], 1 }
 0x2bb   :  { %407 = vsyncpa [#allocation4], 1 }

</bundles_post_ra>
